<compile_context>
chip_gen: v6e
topology: v6e:2x2x1
jax: 0.10.0
libtpu: 0.0.40
codegen_flags: <defaults>
</compile_context>

<pallas_src>
import jax
import jax.numpy as jnp
from jax.experimental import pallas as pl
from jax.experimental.pallas import tpu as pltpu

_SUBLANE_ALIGN = 32            # actor-tile alignment (covers f32's 8 and int8's 32)
_TARGET_BLOCK_BYTES = 3 << 20  # per trajectory input block: x2 inputs x2 buffers ~12 MiB


def _round_up(x, m):
    return ((x + m - 1) // m) * m


def _cdiv(a, b):
    return -(-a // b)


def _num_core_splits():
    """Use a 2-way 'parallel' grid split only on 2-TensorCore chips (v7x).

    On single-TC chips (v5e/v6e) the extra split is just a serial loop with
    extra per-step overhead, so default to 1.  Detection failure -> 1 (safe).
    """
    try:
        kind = jax.devices()[0].device_kind.lower()
    except Exception:
        return 1
    return 2 if ("v7" in kind or "7x" in kind) else 1


def _masked_abs_sum_kernel(reg_ref, gt_ref, mask_ref, out_ref):
    """One actor tile: masked |reg - gt|, accumulated into a resident f32 block.

    reg_ref / gt_ref : [tile_n, W]    input dtype (W = K*T*2, lane-dense)
    mask_ref         : [tile_n, W]    int8 expanded has_preds mask
    out_ref          : [1, tile_n, W] f32 resident accumulator (one row per
                       core split; rows are summed to a scalar in JAX).
    """
    tile = pl.program_id(1)   # 'arbitrary' axis -> resident accumulator

    @pl.when(tile == 0)
    def _init():
        out_ref[...] = jnp.zeros_like(out_ref)

    diff = jnp.abs(reg_ref[...].astype(jnp.float32)
                   - gt_ref[...].astype(jnp.float32))
    # jnp.where (not multiply) so padded / masked entries can never leak
    # non-finite values into the sum.  Pure VPU work, no XLU.
    masked = jnp.where(mask_ref[...] != 0, diff, 0.0)
    out_ref[...] += masked[None]


def masked_l1_sum(reg_list, gt_list, has_preds_list):
    """Unnormalized sum over all scenes of |reg - gt| where has_preds is True.

    reg_list, gt_list : list of [n_i, K, T, 2] float arrays
    has_preds_list    : list of [n_i, T] bool arrays
    Returns a scalar f32 (NOT divided by the element count).
    """
    if len(reg_list) == 0:
        return jnp.float32(0.0)
    n_per_scene = [int(r.shape[0]) for r in reg_list]
    n = sum(n_per_scene)
    if n == 0:
        return jnp.float32(0.0)

    k, t, c = (int(s) for s in reg_list[0].shape[1:])
    w = k * t * c
    reg_dtype = reg_list[0].dtype
    gt_dtype = gt_list[0].dtype
    itemsize = jnp.dtype(reg_dtype).itemsize

    # --- tiling: actors on sublanes, flattened K*T*2 on lanes --------------
    num_splits = _num_core_splits()
    w_lanes = _round_up(w, 128)                       # VMEM lane padding (sizing only)
    max_tile = max(_SUBLANE_ALIGN,
                   (_TARGET_BLOCK_BYTES // (w_lanes * itemsize))
                   // _SUBLANE_ALIGN * _SUBLANE_ALIGN)
    n_aligned = _round_up(n, _SUBLANE_ALIGN * num_splits)
    per_split = n_aligned // num_splits
    tiles_per_split = max(1, _cdiv(per_split, max_tile))
    tile_n = _round_up(_cdiv(per_split, tiles_per_split), _SUBLANE_ALIGN)
    n_pad = num_splits * tiles_per_split * tile_n     # exact grid coverage
    pad_rows = n_pad - n

    # --- single concatenation + zero padding (no transposes: contiguous
    #     (N,K,T,2) reshapes to (N, K*T*2) for free) -------------------------
    reg_cat = jnp.concatenate(
        [r.reshape(r.shape[0], w) for r in reg_list]
        + [jnp.zeros((pad_rows, w), reg_dtype)], axis=0)
    gt_cat = jnp.concatenate(
        [g.reshape(g.shape[0], w) for g in gt_list]
        + [jnp.zeros((pad_rows, w), gt_dtype)], axis=0)
    mask_cat = jnp.concatenate(
        [jnp.broadcast_to(h[:, None, :, None], (h.shape[0], k, t, c))
         .reshape(h.shape[0], w).astype(jnp.int8) for h in has_preds_list]
        + [jnp.zeros((pad_rows, w), jnp.int8)], axis=0)

    grid = (num_splits, tiles_per_split)

    def in_idx(s, i):
        return (s * tiles_per_split + i, 0)

    cost = pl.CostEstimate(
        flops=3 * n_pad * w,
        transcendentals=0,
        bytes_accessed=(2 * n_pad * w * itemsize       # reg + gt reads
                        + n_pad * w                    # int8 mask read
                        + num_splits * tile_n * w * 4))  # accumulator write

    partials = pl.pallas_call(
        _masked_abs_sum_kernel,
        out_shape=jax.ShapeDtypeStruct((num_splits, tile_n, w), jnp.float32),
        grid=grid,
        in_specs=[
            pl.BlockSpec((tile_n, w), in_idx),
            pl.BlockSpec((tile_n, w), in_idx),
            pl.BlockSpec((tile_n, w), in_idx),
        ],
        out_specs=pl.BlockSpec((1, tile_n, w), lambda s, i: (s, 0, 0)),
        compiler_params=pltpu.CompilerParams(
            dimension_semantics=("parallel", "arbitrary"),
            vmem_limit_bytes=32 * 1024 * 1024),
        cost_estimate=cost,
    )(reg_cat, gt_cat, mask_cat)

    # One small reduction of the per-split accumulator blocks, done in JAX.
    return jnp.sum(partials)


def inter_loss_forward(out, gt_list, has_preds_list):
    """JAX/Pallas equivalent of inter_loss.forward (returns the scalar loss)."""
    count = sum(int(r.size) for r in out["reg"])
    if count == 0:
        return jnp.float32(0.0)
    total = masked_l1_sum(out["reg"], gt_list, has_preds_list)
    # torch.nn.L1Loss() (reduction='mean') divides by the TOTAL element count
    # of the concatenated tensor, including masked-out entries.
    return total / jnp.float32(count)


def l1loss_forward(out, data, pred_loss):
    """JAX/Pallas equivalent of L1loss.forward."""
    loss = dict(pred_loss)  # copy pre-computed loss entries through
    loss["loss"] = inter_loss_forward(out, data["gt_new"], data["has_preds"])
    return loss
    # TODO(synk): the PyTorch version also mutates out['reg'] / gt in place
    # (zeroing masked entries); only the returned scalar loss is reproduced.
    # TODO(synk): the rest of the lanegcn forward (ActorNet conv stack, MapNet/
    # M2M sparse index_add_ message passing, Att gather/scatter, PredNet sort)
    # is data-dependent sparse work with no clean Pallas equivalent here.


if __name__ == "__main__":
    key = jax.random.PRNGKey(0)
    k1, k2, k3, k4, k5 = jax.random.split(key, 5)

    # Two "scenes" with ragged actor counts, 6 prediction modes, T=8, xy.
    n0, n1, K, T, C = 5, 3, 6, 8, 2

    reg_list = [
        jax.random.normal(k1, (n0, K, T, C), dtype=jnp.float32),
        jax.random.normal(k2, (n1, K, T, C), dtype=jnp.float32),
    ]
    gt_list = [
        jax.random.normal(k3, (n0, K, T, C), dtype=jnp.float32),
        jax.random.normal(k4, (n1, K, T, C), dtype=jnp.float32),
    ]
    hp_all = jax.random.bernoulli(k5, p=0.7, shape=(n0 + n1, T))
    has_preds_list = [hp_all[:n0], hp_all[n0:]]

    out = {"reg": reg_list}
    data = {"gt_new": gt_list, "has_preds": has_preds_list}
    pred_loss = {"cls": jnp.float32(0.25)}  # pre-existing loss terms pass through

    loss = l1loss_forward(out, data, pred_loss)
    loss_val = jax.block_until_ready(loss["loss"])

    # Pure-JAX reference check of the masked mean-L1 over the concatenation.
    reg_cat = jnp.concatenate(reg_list, axis=0)
    gt_cat = jnp.concatenate(gt_list, axis=0)
    m = hp_all.astype(jnp.float32)[:, None, :, None]
    ref = jnp.sum(jnp.abs(reg_cat * m - gt_cat * m)) / reg_cat.size
    assert jnp.allclose(loss_val, ref, rtol=1e-5, atol=1e-6), (loss_val, ref)
    assert loss["cls"] == pred_loss["cls"]

    print("KERNEL_OK")
</pallas_src>

<mosaic_0001>
module attributes {stable_mosaic.version = 11 : i64} {
  func.func @_masked_abs_sum_kernel(%arg0: i32, %arg1: i32, %arg2: memref<32x96xf32, #tpu.memory_space<vmem>>, %arg3: memref<32x96xf32, #tpu.memory_space<vmem>>, %arg4: memref<32x96xi8, #tpu.memory_space<vmem>>, %arg5: memref<1x32x96xf32, #tpu.memory_space<vmem>>) attributes {dimension_semantics = [#tpu.dimension_semantics<parallel>, #tpu.dimension_semantics<arbitrary>], iteration_bounds = array<i64: 1, 1>, scalar_prefetch = 0 : i64, scratch_operands = 0 : i64, tpu.core_type = #tpu.core_type<tc>, window_params = [{transform_indices = @transform_0, window_bounds = array<i64: 32, 96>}, {transform_indices = @transform_1, window_bounds = array<i64: 32, 96>}, {transform_indices = @transform_2, window_bounds = array<i64: 32, 96>}, {transform_indices = @transform_3, window_bounds = array<i64: 1, 32, 96>}]} {
    %c0_i32 = arith.constant 0 : i32
    %0 = arith.cmpi eq, %arg1, %c0_i32 : i32
    %1 = arith.extui %0 : i1 to i32
    %c0_i32_0 = arith.constant 0 : i32
    %2 = arith.cmpi ne, %1, %c0_i32_0 : i32
    scf.if %2 {
      %cst_12 = arith.constant 0.000000e+00 : f32
      %16 = vector.broadcast %cst_12 : f32 to vector<1x32x96xf32>
      %c0_13 = arith.constant 0 : index
      %c0_14 = arith.constant 0 : index
      %c0_15 = arith.constant 0 : index
      %17 = vector.load %arg5[%c0_13, %c0_14, %c0_15] : memref<1x32x96xf32, #tpu.memory_space<vmem>>, vector<1x32x96xf32>
      tpu.vector_store %arg5[%c0_13, %c0_14, %c0_15], %16 {strides = array<i32>} : memref<1x32x96xf32, #tpu.memory_space<vmem>>, vector<1x32x96xf32>,
    } else {
    }
    %c0 = arith.constant 0 : index
    %c0_1 = arith.constant 0 : index
    %3 = vector.load %arg2[%c0, %c0_1] : memref<32x96xf32, #tpu.memory_space<vmem>>, vector<32x96xf32>
    %c0_2 = arith.constant 0 : index
    %c0_3 = arith.constant 0 : index
    %4 = vector.load %arg3[%c0_2, %c0_3] : memref<32x96xf32, #tpu.memory_space<vmem>>, vector<32x96xf32>
    %5 = arith.subf %3, %4 : vector<32x96xf32>
    %6 = math.absf %5 : vector<32x96xf32>
    %c0_4 = arith.constant 0 : index
    %c0_5 = arith.constant 0 : index
    %7 = vector.load %arg4[%c0_4, %c0_5] : memref<32x96xi8, #tpu.memory_space<vmem>>, vector<32x96xi8>
    %c0_i8 = arith.constant 0 : i8
    %8 = vector.broadcast %c0_i8 : i8 to vector<32x96xi8>
    %9 = arith.cmpi ne, %7, %8 : vector<32x96xi8>
    %cst = arith.constant 0.000000e+00 : f32
    %10 = vector.broadcast %cst : f32 to vector<32x96xf32>
    %11 = arith.select %9, %6, %10 : vector<32x96xi1>, vector<32x96xf32>
    %c0_6 = arith.constant 0 : index
    %c0_7 = arith.constant 0 : index
    %c0_8 = arith.constant 0 : index
    %12 = vector.load %arg5[%c0_6, %c0_7, %c0_8] : memref<1x32x96xf32, #tpu.memory_space<vmem>>, vector<1x32x96xf32>
    %13 = vector.shape_cast %11 : vector<32x96xf32> to vector<1x32x96xf32>
    %14 = arith.addf %12, %13 : vector<1x32x96xf32>
    %c0_9 = arith.constant 0 : index
    %c0_10 = arith.constant 0 : index
    %c0_11 = arith.constant 0 : index
    %15 = vector.load %arg5[%c0_9, %c0_10, %c0_11] : memref<1x32x96xf32, #tpu.memory_space<vmem>>, vector<1x32x96xf32>
    tpu.vector_store %arg5[%c0_9, %c0_10, %c0_11], %14 {strides = array<i32>} : memref<1x32x96xf32, #tpu.memory_space<vmem>>, vector<1x32x96xf32>,
    return
  }
  func.func @transform_0(%arg0: i32, %arg1: i32) -> (i32, i32) {
    %c1_i32 = arith.constant 1 : i32
    %0 = arith.muli %arg0, %c1_i32 : i32
    %1 = arith.addi %0, %arg1 : i32
    %c0_i32 = arith.constant 0 : i32
    %c0_i32_0 = arith.constant 0 : i32
    return %1, %c0_i32 : i32, i32
  }
  func.func @transform_1(%arg0: i32, %arg1: i32) -> (i32, i32) {
    %c1_i32 = arith.constant 1 : i32
    %0 = arith.muli %arg0, %c1_i32 : i32
    %1 = arith.addi %0, %arg1 : i32
    %c0_i32 = arith.constant 0 : i32
    %c0_i32_0 = arith.constant 0 : i32
    return %1, %c0_i32 : i32, i32
  }
  func.func @transform_2(%arg0: i32, %arg1: i32) -> (i32, i32) {
    %c1_i32 = arith.constant 1 : i32
    %0 = arith.muli %arg0, %c1_i32 : i32
    %1 = arith.addi %0, %arg1 : i32
    %c0_i32 = arith.constant 0 : i32
    %c0_i32_0 = arith.constant 0 : i32
    return %1, %c0_i32 : i32, i32
  }
  func.func @transform_3(%arg0: i32, %arg1: i32) -> (i32, i32, i32) {
    %c0_i32 = arith.constant 0 : i32
    %c0_i32_0 = arith.constant 0 : i32
    %c0_i32_1 = arith.constant 0 : i32
    return %arg0, %c0_i32, %c0_i32_0 : i32, i32, i32
  }
}

</mosaic_0001>

<bundles_post_ra>
// kernel: tpu_custom_call.1
= control target key start
LH: loop header
LB: loop body
LE: loop exit
PB: predicated region body
PF: predicated region fallthrough
CT: control target
= control target key end

     0   :  { %8 = vsyncpa [#allocation3], 0  ;;  %s314_s0 = inlined_call_operand.hbm [shape: f32[32,96], index: 0, kind: input, shape index: {}]   ;;  %s315_s1 = inlined_call_operand.hbm [shape: f32[32,96], index: 1, kind: input, shape index: {}]   ;;  %s316_s2 = inlined_call_operand.hbm [shape: s8[32,96], index: 2, kind: input, shape index: {}]   ;;  %s317_s3 = inlined_call_operand.hbm [shape: f32[1,32,96], index: 3, kind: output, shape index: {}]  }
   0x1   :  { %9 = vsyncpa [#allocation6], 0 }
   0x2   :  { %10 = vsyncpa [#allocation4], 0  ;;  %s257_s12 = smov [#allocation5]   ;;  %s258_s14 = smov [#allocation2]  }
   0x3   :  { %s36_s13 = sshll.u32 %s257_s12, 4  ;;  %s20_s15 = sshll.u32 %s258_s14, 4  ;;  %s37_s13 = int_to_ptr.vmem [resolvable:$true] %s36_s13  ;;  %s21_s15 = int_to_ptr.vmem [resolvable:$true] %s20_s15 }
   0x4   :  { %s179_s16 = scalar_lea.vmem %s37_s13, 512  ;;  %p184_p1 = scmp.lt.s32.totalorder %s37_s13, %s37_s13 }
   0x5   :  { %p180_p0 = scmp.ne.s32.totalorder %s37_s13, %s179_s16  ;;  %p185_p2 = scmp.lt.s32.totalorder %s179_s16, %s179_s16 }
   0x7   :  { %p186_p3 = por %p185_p2, %p184_p1 }
   0x9   :  { %p187_p4 = pnand %p186_p3, %p180_p0 }
   0xb   :  { %190 = shalt.err (!%p187_p4)
}
   0xc   :  { %s259_s17 = smov 128   ;;  %s260_s18 = smov 8  }
   0xd   :  { %42 = dma.hbm_to_vmem [thread:$0]  %s315_s1, 512, %s37_s13, [#allocation6], %s259_s17, %s259_s17, %s260_s18  }
   0xe   :  { %s199_s21 = scalar_lea.vmem %s21_s15, 512  ;;  %p204_p6 = scmp.lt.s32.totalorder %s21_s15, %s21_s15 }
   0xf   :  { %p200_p5 = scmp.ne.s32.totalorder %s21_s15, %s199_s21  ;;  %p205_p7 = scmp.lt.s32.totalorder %s199_s21, %s199_s21 }
  0x11   :  { %p206_p8 = por %p205_p7, %p204_p6 }
  0x13   :  { %p207_p9 = pnand %p206_p8, %p200_p5 }
  0x15   :  { %210 = shalt.err (!%p207_p9)
}
  0x16   :  { %26 = dma.hbm_to_vmem [thread:$0]  %s314_s0, 512, %s21_s15, [#allocation3], %s259_s17, %s259_s17, %s260_s18  }
  0x17   :  { %s261_s24 = smov [#allocation7]  }
  0x18   :  { %s52_s25 = sshll.u32 %s261_s24, 4  ;;  %s53_s25 = int_to_ptr.vmem [resolvable:$true] %s52_s25 }
  0x19   :  { %s219_s26 = scalar_lea.vmem %s53_s25, 128  ;;  %p224_p11 = scmp.lt.s32.totalorder %s53_s25, %s53_s25 }
  0x1a   :  { %p220_p10 = scmp.ne.s32.totalorder %s53_s25, %s219_s26  ;;  %p225_p12 = scmp.lt.s32.totalorder %s219_s26, %s219_s26 }
  0x1c   :  { %p226_p13 = por %p225_p12, %p224_p11 }
  0x1e   :  { %p227_p0 = pnand %p226_p13, %p220_p10 }
  0x20   :  { %230 = shalt.err (!%p227_p0)
}
  0x21   :  { %55 = dma.hbm_to_vmem [thread:$0]  %s316_s2, 128, %s53_s25, [#allocation6]  }
  0x22   :  { %251 = dma.done.wait [#allocation3], 512  }
  0x23   :  { %252 = vsyncadd [#allocation3], 4294966784 }
  0x24   :  { %253 = dma.done.wait [#allocation6], 640  }
  0x25   :  { %254 = vsyncadd [#allocation6], 4294966656  ;;  %vm76_vm0 = vcmask 785408   ;;  %v262_v0 = vmov 0.0   ;;  %v81_v1 = vld [vmem:[#allocation2] sm:$0xff]  ;;  %v82_v4 = vld [vmem:[#allocation2 + $0x8] sm:$0xff] }
  0x26   :  { %77 = vst.msk [vmem:[#allocation8] sm:$0xff] %vm76_vm0, %v262_v0  ;;  %78 = vst.msk [vmem:[#allocation8 + $0x8] sm:$0xff] %vm76_vm0, %v262_v0  ;;  %v97_v2 = vld [vmem:[#allocation7] sm:$0xff]  ;;  %v86_v5 = vld [vmem:[#allocation5 + $0x8] sm:$0xff]  ;;  %v263_v6 = vmov 0   ;;  %s264_s0 = smov [#allocation8]  }
  0x27   :  { %79 = vst.msk [vmem:[#allocation8 + $0x10] sm:$0xff] %vm76_vm0, %v262_v0  ;;  %80 = vst.msk [vmem:[#allocation8 + $0x18] sm:$0xff] %vm76_vm0, %v262_v0  ;;  %v85_v3 = vld [vmem:[#allocation5] sm:$0xff]  ;;  %vm98_vm1 = vnez %v97_v2  ;;  %v83_v8 = vld [vmem:[#allocation2 + $0x10] sm:$0xff]  ;;  %v90_v15 = vsub.f32 %v82_v4, %v86_v5  ;;  %s150_s2 = sshll.u32 %s264_s0, 4  ;;  %s151_s2 = int_to_ptr.vmem [resolvable:$true] %s150_s2 }
  0x28   :  { %v99_v7 = vsel %vm98_vm1, 16843009, %v263_v6  ;;  %v87_v9 = vld [vmem:[#allocation5 + $0x10] sm:$0xff]  ;;  %v84_v12 = vld [vmem:[#allocation2 + $0x18] sm:$0xff]  ;;  %v89_v14 = vsub.f32 %v81_v1, %v85_v3  ;;  %s231_s28 = scalar_lea.vmem %s151_s2, 512  ;;  %p236_p2 = scmp.lt.s32.totalorder %s151_s2, %s151_s2 }
  0x29   :  { %v100_v10 = vunpack.c.0.s8 %v99_v7  ;;  %v101_v11 = vunpack.c.1.s8 %v99_v7  ;;  %v88_v13 = vld [vmem:[#allocation5 + $0x18] sm:$0xff]  ;;  %v102_v16 = vunpack.c.2.s8 %v99_v7  ;;  %v103_v17 = vunpack.c.3.s8 %v99_v7  ;;  %p232_p1 = scmp.ne.s32.totalorder %s151_s2, %s231_s28  ;;  %p237_p3 = scmp.lt.s32.totalorder %s231_s28, %s231_s28 }
  0x2a   :  { %v91_v20 = vsub.f32 %v83_v8, %v87_v9  ;;  %v92_v21 = vsub.f32 %v84_v12, %v88_v13  ;;  %v93_v26 = vand.u32 2147483647, %v89_v14  ;;  %v94_v27 = vand.u32 2147483647, %v90_v15 }
  0x2b   :  { %v104_v18 = vpack.c.b16 %v100_v10, %v100_v10  ;;  %v106_v19 = vpack.c.b16 %v101_v11, %v101_v11  ;;  %v108_v22 = vpack.c.b16 %v102_v16, %v102_v16  ;;  %v110_v23 = vpack.c.b16 %v103_v17, %v103_v17  ;;  %p238_p4 = por %p237_p3, %p236_p2 }
  0x2c   :  { %v95_v30 = vand.u32 2147483647, %v91_v20  ;;  %v96_v31 = vand.u32 2147483647, %v92_v21 }
  0x2d   :  { %v105_v24 = vpack.c.b8 %v104_v18, %v104_v18  ;;  %v107_v25 = vpack.c.b8 %v106_v19, %v106_v19  ;;  %v109_v28 = vpack.c.b8 %v108_v22, %v108_v22  ;;  %v111_v29 = vpack.c.b8 %v110_v23, %v110_v23  ;;  %v132_v38 = vld [vmem:[#allocation8] sm:$0xff]  ;;  %v133_v39 = vld [vmem:[#allocation8 + $0x8] sm:$0xff]  ;;  %p239_p5 = pnand %p238_p4, %p232_p1 }
  0x2e   :  { %v134_v42 = vld [vmem:[#allocation8 + $0x10] sm:$0xff]  ;;  %v135_v43 = vld [vmem:[#allocation8 + $0x18] sm:$0xff] }
  0x2f   :  { %vm112_vm2 = vnez %v105_v24  ;;  %vm113_vm3 = vnez %v107_v25  ;;  %vm114_vm4 = vnez %v109_v28  ;;  %vm115_vm5 = vnez %v111_v29 }
  0x30   :  { %v116_v32 = vsel %vm112_vm2, 16843009, %v263_v6  ;;  %v117_v33 = vsel %vm113_vm3, 16843009, %v263_v6  ;;  %v118_v36 = vsel %vm114_vm4, 16843009, %v263_v6 }
  0x31   :  { %v120_v34 = vunpack.c.0.s8 %v116_v32  ;;  %v121_v35 = vunpack.c.0.s8 %v117_v33  ;;  %v119_v37 = vsel %vm115_vm5, 16843009, %v263_v6  ;;  %v122_v40 = vunpack.c.0.s8 %v118_v36 }
  0x32   :  { %v123_v41 = vunpack.c.0.s8 %v119_v37 }
  0x33   :  { %vm124_vm6 = vcmp.ne.s32.totalorder %v120_v34, 0  ;;  %vm125_vm7 = vcmp.ne.s32.totalorder %v121_v35, 0  ;;  %vm126_vm8 = vcmp.ne.s32.totalorder %v122_v40, 0 }
  0x34   :  { %v128_v44 = vsel %vm124_vm6, %v93_v26, 0.0  ;;  %v129_v45 = vsel %vm125_vm7, %v94_v27, 0.0  ;;  %vm127_vm9 = vcmp.ne.s32.totalorder %v123_v41, 0  ;;  %v130_v48 = vsel %vm126_vm8, %v95_v30, 0.0 }
  0x35   :  { %v136_v46 = vadd.f32 %v132_v38, %v128_v44  ;;  %v137_v47 = vadd.f32 %v133_v39, %v129_v45  ;;  %v131_v49 = vsel %vm127_vm9, %v96_v31, 0.0  ;;  %v138_v50 = vadd.f32 %v134_v42, %v130_v48 }
  0x36   :  { %v139_v51 = vadd.f32 %v135_v43, %v131_v49 }
  0x37   :  { %141 = vst.msk [vmem:[#allocation8] sm:$0xff] %vm76_vm0, %v136_v46  ;;  %142 = vst.msk [vmem:[#allocation8 + $0x8] sm:$0xff] %vm76_vm0, %v137_v47 }
  0x38   :  { %143 = vst.msk [vmem:[#allocation8 + $0x10] sm:$0xff] %vm76_vm0, %v138_v50  ;;  %144 = vst.msk [vmem:[#allocation8 + $0x18] sm:$0xff] %vm76_vm0, %v139_v51 }
  0x39   :  { %242 = shalt.err (!%p239_p5)
}
  0x3a   :  { %156 = dma.vmem_to_hbm [thread:$0]  %s151_s2, 512, %s317_s3, [#allocation4], %s259_s17, %s259_s17, %s260_s18  }
  0x3b   :  { %255 = dma.done.wait [#allocation4], 512  }
  0x3c   :  { %256 = vsyncadd [#allocation4], 4294966784 }
  0x3d   :  { %160 = vsyncpa [#allocation3], 1 }
  0x3e   :  { %161 = vsyncpa [#allocation6], 1 }
  0x3f   :  { %162 = vsyncpa [#allocation4], 1 }

</bundles_post_ra>
